<compile_context>
chip_gen: v6e
topology: v6e:2x2x1
jax: 0.10.0
libtpu: 0.0.40
codegen_flags: <defaults>
</compile_context>

<pallas_src>
import math
import functools

import jax
import jax.numpy as jnp
from jax.experimental import pallas as pl
from jax.experimental.pallas import tpu as pltpu

_LANE = 128


def _round_up(v, m):
    return ((v + m - 1) // m) * m


def _num_tensorcores():
    """Best-effort TensorCores-per-chip (2 on v7x); falls back to 1 (v5e/v6e)."""
    try:
        info = pltpu.get_tpu_info()
    except Exception:
        return 1
    for attr in ("num_cores", "num_tensorcores", "tensorcores_per_chip",
                 "cores_per_chip", "core_count"):
        val = getattr(info, attr, None)
        if isinstance(val, int) and val > 0:
            return val
    return 1


# ----------------------------- Pallas kernel --------------------------------
def performer_attention_kernel(x_ref, w_qkv_ref, w_feat_ref, o_ref, *,
                               heads_per_block, seq_len, feat_dim, nb_features,
                               ratio, data_normalizer, eps):
    BHb, N, D, M = heads_per_block, seq_len, feat_dim, nb_features
    Dp = w_qkv_ref.shape[-1] // 3          # per-output lane-tile width (128)
    Mp = w_feat_ref.shape[-1] // 2         # padded nb_features (128)

    # x is already a flat bf16 (BHb*N, D) slab: two fused MXU matmuls cover all
    # projections (q/k/v and both feature maps) for every head in this block.
    x = x_ref[...]                                                       # (R, D) bf16
    qkv = jnp.dot(x, w_qkv_ref[...], preferred_element_type=jnp.float32)   # (R, 3*Dp)
    feats = jnp.dot(x, w_feat_ref[...], preferred_element_type=jnp.float32)  # (R, 2*Mp)
    # TODO(synk): value dropout (p=0.1) is identity at inference; a training
    # path would need pltpu.prng_seed / prng_random_bits here, not host RNG.

    # All slices below start at multiples of 128 lanes (tile-aligned); the
    # reshapes only split the sublane axis (lane dim unchanged).
    q3 = qkv[:, 0:Dp].reshape(BHb, N, Dp)            # only first D lanes nonzero
    k3 = qkv[:, Dp:2 * Dp].reshape(BHb, N, Dp)
    v3 = qkv[:, 2 * Dp:3 * Dp].reshape(BHb, N, Dp)
    qd3 = feats[:, 0:Mp].reshape(BHb, N, Mp)         # only first M lanes nonzero
    kd3 = feats[:, Mp:2 * Mp].reshape(BHb, N, Mp)

    half_dn2 = 0.5 * data_normalizer * data_normalizer
    # Zero-padded lanes contribute 0 to the squared sums, so no masking needed.
    diag_q = jnp.sum(q3 * q3, axis=-1, keepdims=True) * half_dn2        # (BHb, N, 1)
    diag_k = jnp.sum(k3 * k3, axis=-1, keepdims=True) * half_dn2

    # Feature-column validity mask (padded columns must not enter max / sums).
    valid = jax.lax.broadcasted_iota(jnp.int32, (1, 1, Mp), 2) < M
    neg = jnp.float32(-1e30)

    max_q = jnp.max(jnp.where(valid, qd3, neg), axis=-1, keepdims=True)  # per-row (is_query)
    max_k = jnp.max(jnp.where(valid, kd3, neg), axis=-1, keepdims=True)  # per-head global
    max_k = jnp.max(max_k, axis=-2, keepdims=True)                       # (BHb, 1, 1)

    # exp of padded columns is NOT zero -> mask after the exp, before any sum.
    q_prime = jnp.where(valid, ratio * (jnp.exp(qd3 - diag_q - max_q) + eps), 0.0)
    k_prime = jnp.where(valid, ratio * (jnp.exp(kd3 - diag_k - max_k) + eps), 0.0)

    # ---- linear attention (batched over the BHb head axis) ----
    k_cumsum = jnp.sum(k_prime, axis=-2, keepdims=True)                  # (BHb, 1, Mp)
    d_inv = pl.reciprocal(jnp.sum(q_prime * k_cumsum, axis=-1, keepdims=True),
                          approx=True)                                   # (BHb, N, 1)
    context = jnp.einsum('bnm,bnd->bmd',
                         k_prime.astype(jnp.bfloat16), v3.astype(jnp.bfloat16),
                         preferred_element_type=jnp.float32)             # (BHb, Mp, Dp)
    out3 = jnp.einsum('bnm,bmd->bnd',
                      q_prime.astype(jnp.bfloat16), context.astype(jnp.bfloat16),
                      preferred_element_type=jnp.float32)                # (BHb, N, Dp)

    # Single lane-dense store: last dim is a full 128-lane tile (columns >= D
    # are exact zeros and are sliced off in the wrapper).
    o_ref[0] = (out3 * d_inv).astype(o_ref.dtype)


# ------------------------------- wrapper -------------------------------------
def performer_mha_forward(x, wq, wk, wv, proj, *, num_head_groups=None):
    """x: (B, H, N, D) f32.  wq/wk/wv: (D, D) torch-Linear weights.  proj: (M, D)."""
    B, H, N, D = x.shape
    M = proj.shape[0]
    BH = B * H
    dn = float(D) ** -0.25

    # Grid: 1 step on single-TensorCore chips (v5e/v6e), 2 head-groups only
    # where a second TensorCore exists (v7x) so the "parallel" axis shards.
    if num_head_groups is None:
        num_head_groups = 2 if _num_tensorcores() >= 2 else 1
    if num_head_groups > 1 and BH % num_head_groups != 0:
        # TODO(synk): for odd BH on v7x, split a different independent axis
        # instead of collapsing to one group.
        num_head_groups = 1
    G = num_head_groups
    BHb = BH // G
    R = BHb * N                           # rows per grid step

    Dp = _round_up(D, _LANE)              # each of q/k/v gets its own lane tile
    Mp = _round_up(M, _LANE)              # padded feature dim (masked in-kernel)

    # One-time constant weight transforms (not per-token work):
    #  * transpose so every in-kernel matmul is plain `x @ W`,
    #  * concat q/k/v into one fused weight (each padded to a 128-lane tile),
    #  * fold data_normalizer into precomputed W @ proj feature-map weights,
    #  * pre-cast all MXU operands (including x) to bf16; accumulate f32.
    wq_t = jnp.asarray(wq, jnp.float32).T
    wk_t = jnp.asarray(wk, jnp.float32).T
    wv_t = jnp.asarray(wv, jnp.float32).T

    def pad_cols(w, width):
        return jnp.pad(w, ((0, 0), (0, width - w.shape[1])))

    w_qkv = jnp.concatenate(
        [pad_cols(wq_t, Dp), pad_cols(wk_t, Dp), pad_cols(wv_t, Dp)],
        axis=1).astype(jnp.bfloat16)                                    # (D, 3*Dp)

    proj_scaled = jnp.asarray(proj, jnp.float32).T * dn                 # (D, M)
    w_feat = jnp.concatenate(
        [pad_cols(wq_t @ proj_scaled, Mp), pad_cols(wk_t @ proj_scaled, Mp)],
        axis=1).astype(jnp.bfloat16)                                    # (D, 2*Mp)

    x_flat = x.reshape(BH * N, D).astype(jnp.bfloat16)                  # half the DMA bytes

    kernel = functools.partial(
        performer_attention_kernel,
        heads_per_block=BHb, seq_len=N, feat_dim=D, nb_features=M,
        ratio=float(M) ** -0.5, data_normalizer=dn, eps=1e-4)

    rows = BH * N
    flops = (2 * rows * D * (3 * Dp)          # fused q/k/v projection
             + 2 * rows * D * (2 * Mp)        # fused feature-map projection
             + 2 * 2 * BH * N * Mp * Dp       # context + output matmuls
             + 12 * rows * Mp)                # exp / mask / normalize (rough)
    cost = pl.CostEstimate(
        flops=int(flops),
        transcendentals=int(2 * rows * Mp),
        bytes_accessed=int(2 * rows * D
                           + 2 * (D * 3 * Dp + D * 2 * Mp)
                           + 4 * BH * N * Dp))

    out = pl.pallas_call(
        kernel,
        out_shape=jax.ShapeDtypeStruct((G, BHb, N, Dp), jnp.float32),
        grid_spec=pltpu.PrefetchScalarGridSpec(
            num_scalar_prefetch=0,
            grid=(G,),
            in_specs=[
                pl.BlockSpec((R, D), lambda g: (g, 0)),
                # Constant weights: with the default 1-step grid they are
                # fetched exactly once, so multi-buffer depth is moot here.
                pl.BlockSpec((D, 3 * Dp), lambda g: (0, 0)),
                pl.BlockSpec((D, 2 * Mp), lambda g: (0, 0)),
            ],
            out_specs=pl.BlockSpec((1, BHb, N, Dp), lambda g: (g, 0, 0, 0)),
        ),
        compiler_params=pltpu.CompilerParams(
            # Head-group axis is independent -> shards across TCs on v7x.
            dimension_semantics=("parallel",),
        ),
        cost_estimate=cost,
        # TODO(synk): for production N/M add an N grid axis with VMEM
        # accumulators for k_cumsum/context (running-max rescale for max_k),
        # pick the N-tile per chip generation (v7x has 64 MiB VMEM vs 128 MiB)
        # and set vmem_limit_bytes explicitly; unnecessary at these toy shapes.
    )(x_flat, w_qkv, w_feat)

    # Drop the zero lane-padding and restore (B, H, N, D).
    return out[..., :D].reshape(B, H, N, D)


# --------------------- deterministic parameter setup -------------------------
def orthogonal_matrix_chunk(key, cols):
    block = jax.random.normal(key, (cols, cols), dtype=jnp.float32)
    q, _ = jnp.linalg.qr(block)
    return q.T


def gaussian_orthogonal_random_matrix(key, nb_rows, nb_columns, scaling=0):
    nb_full_blocks = nb_rows // nb_columns
    keys = jax.random.split(key, nb_full_blocks + 2)
    blocks = [orthogonal_matrix_chunk(keys[i], nb_columns)
              for i in range(nb_full_blocks)]
    remaining = nb_rows - nb_full_blocks * nb_columns
    if remaining > 0:
        q = orthogonal_matrix_chunk(keys[nb_full_blocks], nb_columns)
        blocks.append(q[:remaining])
    final = jnp.concatenate(blocks, axis=0)
    if scaling == 0:
        multiplier = jnp.linalg.norm(
            jax.random.normal(keys[-1], (nb_rows, nb_columns), dtype=jnp.float32),
            axis=1)
    elif scaling == 1:
        multiplier = math.sqrt(float(nb_columns)) * jnp.ones((nb_rows,), jnp.float32)
    else:
        raise ValueError(f"Invalid scaling {scaling}")
    return multiplier[:, None] * final


def xavier_uniform(key, fan_out, fan_in):
    bound = math.sqrt(6.0 / (fan_in + fan_out))
    return jax.random.uniform(key, (fan_out, fan_in), jnp.float32, -bound, bound)


# ----------------------- pure-JAX references (for checks) ---------------------
def performer_reference_matched(x, wq, wk, wv, proj):
    """Mirrors the kernel's math exactly (bf16 MXU operands, fused feature
    weights, f32 accumulation) for a tight correctness check."""
    B, H, N, D = x.shape
    M = proj.shape[0]
    dn = float(D) ** -0.25
    ratio = float(M) ** -0.5
    eps = 1e-4
    bf = jnp.bfloat16

    x2 = x.reshape(B * H * N, D).astype(bf)
    wq_t = jnp.asarray(wq, jnp.float32).T
    wk_t = jnp.asarray(wk, jnp.float32).T
    wv_t = jnp.asarray(wv, jnp.float32).T
    proj_s = jnp.asarray(proj, jnp.float32).T * dn

    q = jnp.dot(x2, wq_t.astype(bf), preferred_element_type=jnp.float32)
    k = jnp.dot(x2, wk_t.astype(bf), preferred_element_type=jnp.float32)
    v = jnp.dot(x2, wv_t.astype(bf), preferred_element_type=jnp.float32)
    q_dash = jnp.dot(x2, (wq_t @ proj_s).astype(bf), preferred_element_type=jnp.float32)
    k_dash = jnp.dot(x2, (wk_t @ proj_s).astype(bf), preferred_element_type=jnp.float32)

    def r3(a):
        return a.reshape(B * H, N, -1)
    q, k, v, q_dash, k_dash = map(r3, (q, k, v, q_dash, k_dash))

    half = 0.5 * dn * dn
    diag_q = jnp.sum(q * q, -1, keepdims=True) * half
    diag_k = jnp.sum(k * k, -1, keepdims=True) * half
    max_q = jnp.max(q_dash, -1, keepdims=True)
    max_k = jnp.max(k_dash, axis=(-1, -2), keepdims=True)
    q_prime = ratio * (jnp.exp(q_dash - diag_q - max_q) + eps)
    k_prime = ratio * (jnp.exp(k_dash - diag_k - max_k) + eps)

    k_cumsum = jnp.sum(k_prime, -2, keepdims=True)
    d_inv = 1.0 / jnp.sum(q_prime * k_cumsum, -1, keepdims=True)
    context = jnp.einsum('bnm,bnd->bmd', k_prime.astype(bf), v.astype(bf),
                         preferred_element_type=jnp.float32)
    out = jnp.einsum('bnm,bmd->bnd', q_prime.astype(bf), context.astype(bf),
                     preferred_element_type=jnp.float32) * d_inv
    return out.reshape(B, H, N, D)


def performer_reference_f32(x, wq, wk, wv, proj):
    """Full-f32 semantics of the PyTorch module (loose sanity check)."""
    B, H, N, D = x.shape
    M = proj.shape[0]
    dn = float(D) ** -0.25
    ratio = float(M) ** -0.5
    eps = 1e-4
    hp = jax.lax.Precision.HIGHEST

    q = jnp.einsum('bhnd,ed->bhne', x, wq, precision=hp)
    k = jnp.einsum('bhnd,ed->bhne', x, wk, precision=hp)
    v = jnp.einsum('bhnd,ed->bhne', x, wv, precision=hp)
    q_dash = jnp.einsum('bhnd,md->bhnm', dn * q, proj, precision=hp)
    k_dash = jnp.einsum('bhnd,md->bhnm', dn * k, proj, precision=hp)

    half = 0.5 * dn * dn
    diag_q = jnp.sum(q * q, -1, keepdims=True) * half
    diag_k = jnp.sum(k * k, -1, keepdims=True) * half
    q_prime = ratio * (jnp.exp(q_dash - diag_q
                               - jnp.max(q_dash, -1, keepdims=True)) + eps)
    k_prime = ratio * (jnp.exp(k_dash - diag_k
                               - jnp.max(k_dash, axis=(-1, -2), keepdims=True)) + eps)

    k_cumsum = jnp.sum(k_prime, -2, keepdims=True)
    d_inv = 1.0 / jnp.sum(q_prime * k_cumsum, -1, keepdims=True)
    context = jnp.einsum('bhnm,bhne->bhme', k_prime, v, precision=hp)
    out = jnp.einsum('bhnm,bhme->bhne', q_prime, context, precision=hp)
    return out * d_inv


# ---------------------------------- main --------------------------------------
if __name__ == "__main__":
    feat_dim = 16
    num_heads = 1                    # forward is only shape-consistent for 1 head
    dim_heads = feat_dim // num_heads
    nb_features = int(dim_heads * math.log(dim_heads))   # 44

    B, H, N = 2, 2, 8                # input layout (B, H, N, feat_dim)

    root = jax.random.PRNGKey(0)
    k_x, k_q, k_k, k_v, k_p = jax.random.split(root, 5)

    x = jax.random.normal(k_x, (B, H, N, feat_dim), dtype=jnp.float32)
    wq = xavier_uniform(k_q, feat_dim, feat_dim)
    wk = xavier_uniform(k_k, feat_dim, feat_dim)
    wv = xavier_uniform(k_v, feat_dim, feat_dim)
    proj = gaussian_orthogonal_random_matrix(k_p, nb_features, dim_heads, scaling=0)

    out = performer_mha_forward(x, wq, wk, wv, proj)
    out = jax.block_until_ready(out)
    assert out.shape == (B, H, N, feat_dim)

    # Tight check: precision-matched reference (same bf16 operand casts, fused
    # feature weights, f32 accumulation); tolerance also covers the approx
    # EUP reciprocal used for d_inv.
    ref_matched = performer_reference_matched(x, wq, wk, wv, proj)
    assert jnp.allclose(out, ref_matched, atol=1e-2, rtol=1e-2), \
        "mismatch vs precision-matched pure-JAX reference"

    # Loose sanity check vs full-f32 math (tolerance accounts for bf16 MXU inputs).
    ref_f32 = performer_reference_f32(x, wq, wk, wv, proj)
    assert jnp.allclose(out, ref_f32, atol=2e-1, rtol=1e-1), \
        "gross mismatch vs full-precision reference"

    print("KERNEL_OK")
</pallas_src>

<mosaic_0001>
module attributes {stable_mosaic.version = 11 : i64} {
  func.func @performer_attention_kernel(%arg0: i32, %arg1: memref<32x16xbf16, #tpu.memory_space<vmem>>, %arg2: memref<16x384xbf16, #tpu.memory_space<vmem>>, %arg3: memref<16x256xbf16, #tpu.memory_space<vmem>>, %arg4: memref<1x4x8x128xf32, #tpu.memory_space<vmem>>) attributes {dimension_semantics = [#tpu.dimension_semantics<parallel>], iteration_bounds = array<i64: 1>, scalar_prefetch = 0 : i64, scratch_operands = 0 : i64, tpu.core_type = #tpu.core_type<tc>, window_params = [{transform_indices = @transform_0, window_bounds = array<i64: 32, 16>}, {pipeline_mode = #tpu.pipeline_mode<synchronous>, transform_indices = @transform_1, window_bounds = array<i64: 16, 384>}, {pipeline_mode = #tpu.pipeline_mode<synchronous>, transform_indices = @transform_2, window_bounds = array<i64: 16, 256>}, {transform_indices = @transform_3, window_bounds = array<i64: 1, 4, 8, 128>}]} {
    %c0 = arith.constant 0 : index
    %c0_0 = arith.constant 0 : index
    %0 = vector.load %arg1[%c0, %c0_0] : memref<32x16xbf16, #tpu.memory_space<vmem>>, vector<32x16xbf16>
    %c0_1 = arith.constant 0 : index
    %c0_2 = arith.constant 0 : index
    %1 = vector.load %arg2[%c0_1, %c0_2] : memref<16x384xbf16, #tpu.memory_space<vmem>>, vector<16x384xbf16>
    %cst = arith.constant dense<0.000000e+00> : vector<32x384xf32>
    %2 = tpu.matmul %0, %1, %cst {dimension_numbers = #tpu.dot_dimension_numbers<[1], [0], [0], [1], [0, 0, 1, 1], [], []>} : vector<32x16xbf16>, vector<16x384xbf16>, vector<32x384xf32> -> vector<32x384xf32>
    %c0_3 = arith.constant 0 : index
    %c0_4 = arith.constant 0 : index
    %3 = vector.load %arg3[%c0_3, %c0_4] : memref<16x256xbf16, #tpu.memory_space<vmem>>, vector<16x256xbf16>
    %cst_5 = arith.constant dense<0.000000e+00> : vector<32x256xf32>
    %4 = tpu.matmul %0, %3, %cst_5 {dimension_numbers = #tpu.dot_dimension_numbers<[1], [0], [0], [1], [0, 0, 1, 1], [], []>} : vector<32x16xbf16>, vector<16x256xbf16>, vector<32x256xf32> -> vector<32x256xf32>
    %5 = vector.extract_strided_slice %2 {offsets = [0, 0], sizes = [32, 128], strides = [1, 1]} : vector<32x384xf32> to vector<32x128xf32>
    %6 = vector.shape_cast %5 : vector<32x128xf32> to vector<4x8x128xf32>
    %7 = vector.extract_strided_slice %2 {offsets = [0, 128], sizes = [32, 128], strides = [1, 1]} : vector<32x384xf32> to vector<32x128xf32>
    %8 = vector.shape_cast %7 : vector<32x128xf32> to vector<4x8x128xf32>
    %9 = vector.extract_strided_slice %2 {offsets = [0, 256], sizes = [32, 128], strides = [1, 1]} : vector<32x384xf32> to vector<32x128xf32>
    %10 = vector.shape_cast %9 : vector<32x128xf32> to vector<4x8x128xf32>
    %11 = vector.extract_strided_slice %4 {offsets = [0, 0], sizes = [32, 128], strides = [1, 1]} : vector<32x256xf32> to vector<32x128xf32>
    %12 = vector.shape_cast %11 : vector<32x128xf32> to vector<4x8x128xf32>
    %13 = vector.extract_strided_slice %4 {offsets = [0, 128], sizes = [32, 128], strides = [1, 1]} : vector<32x256xf32> to vector<32x128xf32>
    %14 = vector.shape_cast %13 : vector<32x128xf32> to vector<4x8x128xf32>
    %15 = arith.mulf %6, %6 : vector<4x8x128xf32>
    %cst_6 = arith.constant dense<0.000000e+00> : vector<4x8xf32>
    %16 = vector.multi_reduction <add>, %15, %cst_6 [2] : vector<4x8x128xf32> to vector<4x8xf32>
    %17 = vector.shape_cast %16 : vector<4x8xf32> to vector<4x8x1xf32>
    %cst_7 = arith.constant 1.250000e-01 : f32
    %18 = vector.broadcast %cst_7 : f32 to vector<4x8x1xf32>
    %19 = arith.mulf %17, %18 : vector<4x8x1xf32>
    %20 = arith.mulf %8, %8 : vector<4x8x128xf32>
    %cst_8 = arith.constant dense<0.000000e+00> : vector<4x8xf32>
    %21 = vector.multi_reduction <add>, %20, %cst_8 [2] : vector<4x8x128xf32> to vector<4x8xf32>
    %22 = vector.shape_cast %21 : vector<4x8xf32> to vector<4x8x1xf32>
    %cst_9 = arith.constant 1.250000e-01 : f32
    %23 = vector.broadcast %cst_9 : f32 to vector<4x8x1xf32>
    %24 = arith.mulf %22, %23 : vector<4x8x1xf32>
    %25 = tpu.iota {dimensions = array<i32: 2>} : vector<1x1x128xi32>
    %c44_i32 = arith.constant 44 : i32
    %26 = vector.broadcast %c44_i32 : i32 to vector<1x1x128xi32>
    %27 = arith.cmpi slt, %25, %26 : vector<1x1x128xi32>
    %cst_10 = arith.constant -1.000000e+30 : f32
    %28 = vector.shape_cast %27 : vector<1x1x128xi1> to vector<1x1x128xi1>
    %29 = vector.broadcast %28 : vector<1x1x128xi1> to vector<4x8x128xi1>
    %30 = vector.broadcast %cst_10 : f32 to vector<4x8x128xf32>
    %31 = arith.select %29, %12, %30 : vector<4x8x128xi1>, vector<4x8x128xf32>
    %cst_11 = arith.constant dense<0xFF800000> : vector<4x8xf32>
    %32 = vector.multi_reduction <maximumf>, %31, %cst_11 [2] : vector<4x8x128xf32> to vector<4x8xf32>
    %33 = vector.shape_cast %32 : vector<4x8xf32> to vector<4x8x1xf32>
    %cst_12 = arith.constant -1.000000e+30 : f32
    %34 = vector.shape_cast %27 : vector<1x1x128xi1> to vector<1x1x128xi1>
    %35 = vector.broadcast %34 : vector<1x1x128xi1> to vector<4x8x128xi1>
    %36 = vector.broadcast %cst_12 : f32 to vector<4x8x128xf32>
    %37 = arith.select %35, %14, %36 : vector<4x8x128xi1>, vector<4x8x128xf32>
    %cst_13 = arith.constant dense<0xFF800000> : vector<4x8xf32>
    %38 = vector.multi_reduction <maximumf>, %37, %cst_13 [2] : vector<4x8x128xf32> to vector<4x8xf32>
    %39 = vector.shape_cast %38 : vector<4x8xf32> to vector<4x8x1xf32>
    %cst_14 = arith.constant dense<0xFF800000> : vector<4x1xf32>
    %40 = vector.multi_reduction <maximumf>, %39, %cst_14 [1] : vector<4x8x1xf32> to vector<4x1xf32>
    %41 = vector.shape_cast %40 : vector<4x1xf32> to vector<4x1x1xf32>
    %42 = vector.broadcast %19 : vector<4x8x1xf32> to vector<4x8x128xf32>
    %43 = arith.subf %12, %42 : vector<4x8x128xf32>
    %44 = vector.broadcast %33 : vector<4x8x1xf32> to vector<4x8x128xf32>
    %45 = arith.subf %43, %44 : vector<4x8x128xf32>
    %46 = math.exp %45 : vector<4x8x128xf32>
    %cst_15 = arith.constant 9.99999974E-5 : f32
    %47 = vector.broadcast %cst_15 : f32 to vector<4x8x128xf32>
    %48 = arith.addf %46, %47 : vector<4x8x128xf32>
    %cst_16 = arith.constant 0.150755674 : f32
    %49 = vector.broadcast %cst_16 : f32 to vector<4x8x128xf32>
    %50 = arith.mulf %49, %48 : vector<4x8x128xf32>
    %cst_17 = arith.constant 0.000000e+00 : f32
    %51 = vector.shape_cast %27 : vector<1x1x128xi1> to vector<1x1x128xi1>
    %52 = vector.broadcast %51 : vector<1x1x128xi1> to vector<4x8x128xi1>
    %53 = vector.broadcast %cst_17 : f32 to vector<4x8x128xf32>
    %54 = arith.select %52, %50, %53 : vector<4x8x128xi1>, vector<4x8x128xf32>
    %55 = vector.broadcast %24 : vector<4x8x1xf32> to vector<4x8x128xf32>
    %56 = arith.subf %14, %55 : vector<4x8x128xf32>
    %57 = vector.broadcast %41 : vector<4x1x1xf32> to vector<4x8x128xf32>
    %58 = arith.subf %56, %57 : vector<4x8x128xf32>
    %59 = math.exp %58 : vector<4x8x128xf32>
    %cst_18 = arith.constant 9.99999974E-5 : f32
    %60 = vector.broadcast %cst_18 : f32 to vector<4x8x128xf32>
    %61 = arith.addf %59, %60 : vector<4x8x128xf32>
    %cst_19 = arith.constant 0.150755674 : f32
    %62 = vector.broadcast %cst_19 : f32 to vector<4x8x128xf32>
    %63 = arith.mulf %62, %61 : vector<4x8x128xf32>
    %cst_20 = arith.constant 0.000000e+00 : f32
    %64 = vector.shape_cast %27 : vector<1x1x128xi1> to vector<1x1x128xi1>
    %65 = vector.broadcast %64 : vector<1x1x128xi1> to vector<4x8x128xi1>
    %66 = vector.broadcast %cst_20 : f32 to vector<4x8x128xf32>
    %67 = arith.select %65, %63, %66 : vector<4x8x128xi1>, vector<4x8x128xf32>
    %cst_21 = arith.constant dense<0.000000e+00> : vector<4x128xf32>
    %68 = vector.multi_reduction <add>, %67, %cst_21 [1] : vector<4x8x128xf32> to vector<4x128xf32>
    %69 = vector.shape_cast %68 : vector<4x128xf32> to vector<4x1x128xf32>
    %70 = vector.broadcast %69 : vector<4x1x128xf32> to vector<4x8x128xf32>
    %71 = arith.mulf %54, %70 : vector<4x8x128xf32>
    %cst_22 = arith.constant dense<0.000000e+00> : vector<4x8xf32>
    %72 = vector.multi_reduction <add>, %71, %cst_22 [2] : vector<4x8x128xf32> to vector<4x8xf32>
    %73 = vector.shape_cast %72 : vector<4x8xf32> to vector<4x8x1xf32>
    %74 = tpu.reciprocal %73 {approx = true} : vector<4x8x1xf32> -> vector<4x8x1xf32>
    %75 = arith.truncf %67 : vector<4x8x128xf32> to vector<4x8x128xbf16>
    %76 = arith.truncf %10 : vector<4x8x128xf32> to vector<4x8x128xbf16>
    "tpu.trace_start"() <{level = 10 : i32, message = "bnm,bnd->bmd"}> : () -> ()
    %cst_23 = arith.constant dense<0.000000e+00> : vector<4x128x128xf32>
    %77 = tpu.matmul %75, %76, %cst_23 {dimension_numbers = #tpu.dot_dimension_numbers<[1], [1], [2], [2], [0, 0, 0, 2, 1, 2], [0], [0]>} : vector<4x8x128xbf16>, vector<4x8x128xbf16>, vector<4x128x128xf32> -> vector<4x128x128xf32>
    "tpu.trace_stop"() : () -> ()
    %78 = arith.truncf %54 : vector<4x8x128xf32> to vector<4x8x128xbf16>
    %79 = arith.truncf %77 : vector<4x128x128xf32> to vector<4x128x128xbf16>
    "tpu.trace_start"() <{level = 10 : i32, message = "bnm,bmd->bnd"}> : () -> ()
    %cst_24 = arith.constant dense<0.000000e+00> : vector<4x8x128xf32>
    %80 = tpu.matmul %78, %79, %cst_24 {dimension_numbers = #tpu.dot_dimension_numbers<[2], [1], [1], [2], [0, 0, 0, 1, 1, 2], [0], [0]>} : vector<4x8x128xbf16>, vector<4x128x128xbf16>, vector<4x8x128xf32> -> vector<4x8x128xf32>
    "tpu.trace_stop"() : () -> ()
    %81 = vector.broadcast %74 : vector<4x8x1xf32> to vector<4x8x128xf32>
    %82 = arith.mulf %80, %81 : vector<4x8x128xf32>
    %c0_25 = arith.constant 0 : index
    %c0_26 = arith.constant 0 : index
    %c0_27 = arith.constant 0 : index
    %c0_28 = arith.constant 0 : index
    %83 = vector.load %arg4[%c0_25, %c0_26, %c0_27, %c0_28] : memref<1x4x8x128xf32, #tpu.memory_space<vmem>>, vector<1x4x8x128xf32>
    %84 = vector.shape_cast %83 : vector<1x4x8x128xf32> to vector<4x8x128xf32>
    %85 = vector.shape_cast %82 : vector<4x8x128xf32> to vector<1x4x8x128xf32>
    tpu.vector_store %arg4[%c0_25, %c0_26, %c0_27, %c0_28], %85 {strides = array<i32>} : memref<1x4x8x128xf32, #tpu.memory_space<vmem>>, vector<1x4x8x128xf32>,
    return
  }
  func.func @transform_0(%arg0: i32) -> (i32, i32) {
    %c0_i32 = arith.constant 0 : i32
    %c0_i32_0 = arith.constant 0 : i32
    return %arg0, %c0_i32 : i32, i32
  }
  func.func @transform_1(%arg0: i32) -> (i32, i32) {
    %c0_i32 = arith.constant 0 : i32
    %c0_i32_0 = arith.constant 0 : i32
    %c0_i32_1 = arith.constant 0 : i32
    return %c0_i32, %c0_i32_0 : i32, i32
  }
  func.func @transform_2(%arg0: i32) -> (i32, i32) {
    %c0_i32 = arith.constant 0 : i32
    %c0_i32_0 = arith.constant 0 : i32
    %c0_i32_1 = arith.constant 0 : i32
    return %c0_i32, %c0_i32_0 : i32, i32
  }
  func.func @transform_3(%arg0: i32) -> (i32, i32, i32, i32) {
    %c0_i32 = arith.constant 0 : i32
    %c0_i32_0 = arith.constant 0 : i32
    %c0_i32_1 = arith.constant 0 : i32
    %c0_i32_2 = arith.constant 0 : i32
    return %arg0, %c0_i32, %c0_i32_0, %c0_i32_1 : i32, i32, i32, i32
  }
}

</mosaic_0001>

<bundles_post_ra>
// kernel: tpu_custom_call.1
= control target key start
LH: loop header
LB: loop body
LE: loop exit
PB: predicated region body
PF: predicated region fallthrough
CT: control target
= control target key end

     0   :  { %8 = vsyncpa [#allocation3], 0  ;;  %s1953_s0 = inlined_call_operand.vmem [shape: bf16[32,16], index: 0, kind: input, shape index: {}]   ;;  %s1954_s1 = inlined_call_operand.vmem [shape: bf16[16,384], index: 1, kind: input, shape index: {}]   ;;  %s1955_s2 = inlined_call_operand.hbm [shape: bf16[16,256], index: 2, kind: input, shape index: {}]   ;;  %s1956_s3 = inlined_call_operand.hbm [shape: f32[1,4,8,128], index: 3, kind: output, shape index: {}]  }
   0x1   :  { %9 = vsyncpa [#allocation4], 0  ;;  %s1588_s12 = smov [#allocation2]  }
   0x2   :  { %s19_s13 = sshll.u32 %s1588_s12, 4  ;;  %s20_s13 = int_to_ptr.vmem [resolvable:$true] %s19_s13 }
   0x3   :  { %s1552_s14 = scalar_lea.vmem %s20_s13, 256  ;;  %p1557_p1 = scmp.lt.s32.totalorder %s20_s13, %s20_s13 }
   0x4   :  { %p1553_p0 = scmp.ne.s32.totalorder %s20_s13, %s1552_s14  ;;  %p1558_p2 = scmp.lt.s32.totalorder %s1552_s14, %s1552_s14 }
   0x6   :  { %p1559_p3 = por %p1558_p2, %p1557_p1 }
   0x8   :  { %p1560_p4 = pnand %p1559_p3, %p1553_p0 }
   0xa   :  { %1563 = shalt.err (!%p1560_p4)
}
   0xb   :  { %s1589_s15 = smov 128   ;;  %s1590_s16 = smov 8  }
   0xc   :  { %25 = dma.hbm_to_vmem [thread:$0]  %s1955_s2, 256, %s20_s13, [#allocation3], %s1589_s15, %s1589_s15, %s1590_s16  }
   0xd   :  { %1584 = dma.done.wait [#allocation3], 256  }
   0xe   :  { %1585 = vsyncadd [#allocation3], 4294967040  ;;  %v1591_v0 = vmov 0   ;;  %v1511_v1 = vld [vmem:[%s1954_s1 + $0x4] ss:$12 sps:$4 sm:$0xff]   ;;  %vm64_vm0 = vcmask 130048   ;;  %v270_v13 = vlaneseq }
   0xf   :  { %103 = vmatprep.mubr.bf16.mxu0 %v1591_v0  ;;  %v1513_v2 = vld [vmem:[%s1954_s1 + $0x8] ss:$12 sps:$4 sm:$0xff]   ;;  %85 = vmatprep.subr.bf16.mxu0 %v1511_v1  ;;  %v1514_v3 = vld [vmem:[%s1954_s1] ss:$12 sps:$4 sm:$0xff]   ;;  %vm468_vm1 = vcmask 1043456   ;;  %vm443_vm3 = vcmask 64512  }
  0x10   :  { %1342 = vmatprep.subr.bf16.mxu1 %v1513_v2  ;;  %v1515_v4 = vld [vmem:[%s1953_s0] sm:$0xff]   ;;  %86 = vmatpush1.bf16.msra.mxu0 %v1514_v3  ;;  %v1516_v5 = vld [vmem:[%s1953_s0 + $0x8] sm:$0xff]   ;;  %v1651_v23 = vand.u32 127, %v270_v13  ;;  %vm1593_vm4 = vmmov 0   ;;  %s1594_s0 = smov [#allocation5]  }
  0x11   :  { %1343 = vmatpush3.bf16.msra.mxu1 %v1513_v2  ;;  %1344 = vmatprep.mubr.msk.bf16.mxu1 %vm64_vm0, %v1515_v4  ;;  %v1517_v6 = vld [vmem:[#allocation2] ss:$8 sps:$4 sm:$0xff]   ;;  %v1519_v7 = vld [vmem:[#allocation2 + $0x4] ss:$8 sps:$4 sm:$0xff]   ;;  %s1198_s1 = sshll.u32 %s1594_s0, 4  ;;  %s1199_s1 = int_to_ptr.vmem [resolvable:$true] %s1198_s1 }
  0x12   :  { %199 = vmatprep.subr.bf16.mxu1 %v1519_v7  ;;  %vm272_vm2 = vcmp.lt.s32.totalorder %v1651_v23, 44  ;;  %s1564_s28 = scalar_lea.vmem %s1199_s1, 512  ;;  %p1569_p6 = scmp.lt.s32.totalorder %s1199_s1, %s1199_s1 }
  0x13   :  { %1215 = vmatmul.mubr.msk.bf16.vlgmr.msra.gmra.mxu0 %vm64_vm0, %v1515_v4  ;;  %vm1888_vm5 = vmpackc.low %vm272_vm2, %vm272_vm2  ;;  %p1565_p5 = scmp.ne.s32.totalorder %s1199_s1, %s1564_s28  ;;  %p1570_p7 = scmp.lt.s32.totalorder %s1564_s28, %s1564_s28 }
  0x14   :  { %1345 = vmatmul.mubr.msk.bf16.vlgmr.msra.gmra.mxu1 %vm64_vm0, %v1516_v5  ;;  %113 = vmatprep.mubr.bf16.mxu0 %v1591_v0 }
  0x15   :  { %217 = vmatprep.mubr.bf16.mxu1 %v1591_v0  ;;  %200 = vmatpush1.bf16.msra.mxu1 %v1517_v6  ;;  %p1571_p8 = por %p1570_p7, %p1569_p6 }
  0x17   :  { %p1572_p9 = pnand %p1571_p8, %p1565_p5 }
  0x1b   :  { %1216 = vmatmul.mubr.msk.bf16.gmra.mxu0 %vm64_vm0, %v1516_v5 }
  0x1c   :  { %1221 = vmatmul.mubr.msk.bf16.vlgmr.msra.gmra.mxu1 %vm64_vm0, %v1515_v4 }
  0x1d   :  { %227 = vmatprep.mubr.bf16.mxu1 %v1591_v0 }
  0x24   :  { %1222 = vmatmul.mubr.msk.bf16.gmra.mxu1 %vm64_vm0, %v1516_v5 }
  0xd3   :  { %v1642_v8 = vpop.f32.mrf.mxu0 }
  0xd4   :  { %v1346_v9 = vpop.f32.mrf.mxu1 }
  0xd5   :  { %v425_v10 = vpack.c.bf16 %v1346_v9, %v1346_v9  ;;  %v107_v11 = vpop.f32.mrf.mxu0 }
  0xd6   :  { %v158_v12 = vpop.f32.mrf.mxu1  ;;  %v254_v16 = vmul.f32 %v107_v11, %v107_v11 }
  0xd7   :  { %v1645_v14 = vsel %vm468_vm1, %v425_v10, 0  ;;  %v423_v15 = vpack.c.bf16 %v158_v12, %v158_v12  ;;  %v1647_v17 = vpop.f32.mrf.mxu0 }
  0xd8   :  { %v1347_v18 = vpop.f32.mrf.mxu1  ;;  %258 = vadd.xlane.f32.xlu1 %v254_v16 }
  0xd9   :  { %v470_v19 = vsel %vm468_vm1, %v423_v15, 0  ;;  %v426_v20 = vpack.c.bf16 %v1347_v18, %v1347_v18  ;;  %1500 = vmatprep.subr.msk.bf16.mxu0 %vm468_vm1, %v423_v15  ;;  %v111_v21 = vpop.f32.mrf.mxu0 }
  0xda   :  { %v161_v22 = vpop.f32.mrf.mxu1  ;;  %1349 = vmatpush3.bf16.msra.mxu0 %v470_v19  ;;  %v255_v25 = vmul.f32 %v111_v21, %v111_v21 }
  0xdb   :  { %v1654_v24 = vsel %vm468_vm1, %v426_v20, 0  ;;  %v424_v26 = vpack.c.bf16 %v161_v22, %v161_v22  ;;  %1502 = vmatprep.subr.msk.bf16.mxu0 %vm468_vm1, %v425_v10  ;;  %v1661_v29 = vpop.f32.mrf.mxu0 }
  0xdc   :  { %v1657_v27 = vpop.f32.mrf.mxu1  ;;  %260 = vadd.xlane.f32.xlu1 %v255_v25 }
  0xdd   :  { %v610_v28 = vsel %vm468_vm1, %v424_v26, 0  ;;  %1501 = vmatprep.subr.msk.bf16.mxu1 %vm468_vm1, %v424_v26  ;;  %v117_v33 = vpop.f32.mrf.mxu0 }
  0xde   :  { %v221_v30 = vpop.f32.mrf.mxu1  ;;  %1367 = vmatpush3.bf16.msra.mxu1 %v610_v28  ;;  %v256_v41 = vmul.f32 %v117_v33, %v117_v33 }
  0xdf   :  { %1503 = vmatprep.subr.msk.bf16.mxu1 %vm468_vm1, %v426_v20  ;;  %v287_v31 = vsel %vm272_vm2, %v221_v30, -1e+30  ;;  %v1673_v37 = vpop.f32.mrf.mxu0 }
  0xe0   :  { %291 = vmax.xlane.f32.xlu0 %v287_v31  ;;  %v1667_v32 = vpop.f32.mrf.mxu1 }
  0xe1   :  { %v121_v42 = vpop.f32.mrf.mxu0 }
  0xe2   :  { %v225_v34 = vpop.f32.mrf.mxu1  ;;  %v257_v45 = vmul.f32 %v121_v42, %v121_v42 }
  0xe3   :  { %v288_v35 = vsel %vm272_vm2, %v225_v34, -1e+30 }
  0xe4   :  { %293 = vmax.xlane.f32.xlu0 %v288_v35  ;;  %v1671_v36 = vpop.f32.mrf.mxu1 }
  0xe6   :  { %v231_v38 = vpop.f32.mrf.mxu1 }
  0xe7   :  { %v289_v39 = vsel %vm272_vm2, %v231_v38, -1e+30 }
  0xe8   :  { %295 = vmax.xlane.f32.xlu0 %v289_v39  ;;  %v1677_v40 = vpop.f32.mrf.mxu1 }
  0xea   :  { %v235_v43 = vpop.f32.mrf.mxu1 }
  0xeb   :  { %v290_v44 = vsel %vm272_vm2, %v235_v43, -1e+30 }
  0xec   :  { %297 = vmax.xlane.f32.xlu1 %v290_v44  ;;  %262 = vadd.xlane.f32.xlu0 %v256_v41 }
  0xf0   :  { %264 = vadd.xlane.f32.xlu1 %v257_v45 }
 0x161   :  { %v259_v48 = vpop.xlane.xlu1 %258 }
 0x162   :  { %v266_v53 = vmul.f32 0.125, %v259_v48 }
 0x164   :  { %v351_v61 = vsub.f32 %v221_v30, %v266_v53 }
 0x165   :  { %v261_v56 = vpop.xlane.xlu1 %260 }
 0x166   :  { %v267_v62 = vmul.f32 0.125, %v261_v56 }
 0x168   :  { %v352_v7 = vsub.f32 %v225_v34, %v267_v62  ;;  %v239_v62 = vmul.f32 %v1647_v17, %v1647_v17  ;;  %v277_v17 = vsel %vm272_vm2, %v1671_v36, -1e+30 }
 0x169   :  { %v292_v46 = vpop.xlane.xlu0 %291 }
 0x16a   :  { %v299_v47 = vrot.slane %v292_v46, 4 }
 0x16c   :  { %v300_v49 = vmax.f32 %v292_v46, %v299_v47 }
 0x16d   :  { %v294_v50 = vpop.xlane.xlu0 %293 }
 0x16e   :  { %v301_v51 = vrot.slane %v300_v49, 2  ;;  %v305_v52 = vrot.slane %v294_v50, 4 }
 0x170   :  { %v302_v54 = vmax.f32 %v300_v49, %v301_v51  ;;  %v306_v55 = vmax.f32 %v294_v50, %v305_v52 }
 0x171   :  { %v296_v57 = vpop.xlane.xlu0 %295 }
 0x172   :  { %v303_v58 = vrot.slane %v302_v54, 1  ;;  %v307_v59 = vrot.slane %v306_v55, 2  ;;  %v311_v60 = vrot.slane %v296_v57, 4 }
 0x174   :  { %v304_v63 = vmax.f32 %v302_v54, %v303_v58  ;;  %v308_v0 = vmax.f32 %v306_v55, %v307_v59  ;;  %v312_v1 = vmax.f32 %v296_v57, %v311_v60 }
 0x175   :  { %v298_v2 = vpop.xlane.xlu1 %297  ;;  %v263_v18 = vpop.xlane.xlu0 %262 }
 0x176   :  { %v355_v3 = vsub.f32 %v351_v61, %v304_v63  ;;  %v309_v4 = vrot.slane %v308_v0, 1  ;;  %v317_v5 = vrot.slane %v298_v2, 4  ;;  %v313_v6 = vrot.slane %v312_v1, 2 }
 0x177   :  { %v268_v21 = vmul.f32 0.125, %v263_v18  ;;  %v238_v61 = vmul.f32 %v1642_v8, %v1642_v8  ;;  %v275_v63 = vsel %vm272_vm2, %v1657_v27, -1e+30  ;;  %v241_v8 = vmul.f32 %v1673_v37, %v1673_v37 }
 0x178   :  { %v359_v9 = vmul.f32 1.442695, %v355_v3  ;;  %v310_v10 = vmax.f32 %v308_v0, %v309_v4  ;;  %v318_v11 = vmax.f32 %v298_v2, %v317_v5  ;;  %v314_v13 = vmax.f32 %v312_v1, %v313_v6 }
 0x179   :  { %v265_v22 = vpop.xlane.xlu1 %264  ;;  %v353_v28 = vsub.f32 %v231_v38, %v268_v21  ;;  %v240_v0 = vmul.f32 %v1661_v29, %v1661_v29  ;;  %v276_v1 = vsel %vm272_vm2, %v1667_v32, -1e+30  ;;  %v278_v2 = vsel %vm272_vm2, %v1677_v40, -1e+30 }
 0x17a   :  { %1520 = vpow2.f32 %v359_v9  ;;  %v356_v12 = vsub.f32 %v352_v7, %v310_v10  ;;  %v319_v15 = vrot.slane %v318_v11, 2  ;;  %v315_v19 = vrot.slane %v314_v13, 1 }
 0x17b   :  { %v269_v30 = vmul.f32 0.125, %v265_v22 }
 0x17c   :  { %v361_v16 = vmul.f32 1.442695, %v356_v12  ;;  %v320_v20 = vmax.f32 %v318_v11, %v319_v15  ;;  %v316_v25 = vmax.f32 %v314_v13, %v315_v19 }
 0x17d   :  { %v354_v39 = vsub.f32 %v235_v43, %v269_v30 }
 0x17e   :  { %1522 = vpow2.f32 %v361_v16  ;;  %v321_v26 = vrot.slane %v320_v20, 1  ;;  %v357_v34 = vsub.f32 %v353_v28, %v316_v25 }
 0x180   :  { %v322_v33 = vmax.f32 %v320_v20, %v321_v26  ;;  %v363_v44 = vmul.f32 1.442695, %v357_v34 }
 0x182   :  { %v358_v45 = vsub.f32 %v354_v39, %v322_v33  ;;  %1524 = vpow2.f32 %v363_v44  ;;  %v1592_v44 = vmov 0.0  }
 0x184   :  { %v365_v38 = vmul.f32 1.442695, %v358_v45 }
 0x186   :  { %1526 = vpow2.f32 %v365_v38 }
 0x187   :  { %v1521_v31 = vpop.eup %1520 }
 0x188   :  { %v367_v35 = vadd.f32 0.0001, %v1521_v31 }
 0x18a   :  { %v371_v41 = vmul.f32 0.15075567, %v367_v35 }
 0x18b   :  { %v1523_v42 = vpop.eup %1522 }
 0x18c   :  { %v1683_v46 = vsel %vm272_vm2, %v371_v41, 0.0  ;;  %v368_v47 = vadd.f32 0.0001, %v1523_v42 }
 0x18d   :  { %v419_v48 = vpack.c.bf16 %v1683_v46, %v1683_v46 }
 0x18e   :  { %v372_v49 = vmul.f32 0.15075567, %v368_v47 }
 0x18f   :  { %427 = vxpose.xlu0.c.b16.start.end [1/1] (short) %v419_v48, 128  ;;  %v1525_v51 = vpop.eup %1524 }
 0x190   :  { %v1689_v50 = vsel %vm272_vm2, %v372_v49, 0.0  ;;  %v369_v52 = vadd.f32 0.0001, %v1525_v51 }
 0x191   :  { %v420_v43 = vpack.c.bf16 %v1689_v50, %v1689_v50 }
 0x192   :  { %v373_v54 = vmul.f32 0.15075567, %v369_v52  ;;  %v379_v52 = vrot.slane %v1683_v46, 4 }
 0x193   :  { %569 = vxpose.xlu1.c.b16.start.end [1/1] (short) %v420_v43, 128  ;;  %v1527_v53 = vpop.eup %1526 }
 0x194   :  { %v370_v55 = vadd.f32 0.0001, %v1527_v53  ;;  %v1695_v56 = vsel %vm272_vm2, %v373_v54, 0.0 }
 0x195   :  { %v421_v58 = vpack.c.bf16 %v1695_v56, %v1695_v56 }
 0x196   :  { %v374_v57 = vmul.f32 0.15075567, %v370_v55 }
 0x198   :  { %v1701_v59 = vsel %vm272_vm2, %v374_v57, 0.0 }
 0x199   :  { %v422_v60 = vpack.c.bf16 %v1701_v59, %v1701_v59 }
 0x1ac   :  { %709 = vxpose.xlu0.c.b16.start.end [1/1] (short) %v421_v58, 128 }
 0x1b0   :  { %849 = vxpose.xlu1.c.b16.start.end [1/1] (short) %v422_v60, 128 }
 0x1d5   :  { %242 = vadd.xlane.f32.xlu0 %v238_v61  ;;  %v380_v61 = vadd.f32 %v379_v52, %v1683_v46 }
 0x1d9   :  { %279 = vmax.xlane.f32.xlu0 %v275_v63  ;;  %244 = vadd.xlane.f32.xlu1 %v239_v62  ;;  %v385_v62 = vrot.slane %v1689_v50, 4 }
 0x1dd   :  { %246 = vadd.xlane.f32.xlu0 %v240_v0  ;;  %281 = vmax.xlane.f32.xlu1 %v276_v1 }
 0x1e1   :  { %283 = vmax.xlane.f32.xlu0 %v277_v17  ;;  %248 = vadd.xlane.f32.xlu1 %v241_v8 }
 0x1e5   :  { %285 = vmax.xlane.f32.xlu1 %v278_v2  ;;  %v386_v2 = vadd.f32 %v385_v62, %v1689_v50 }
 0x1f1   :  { %v435_v29 = vpop.trf.xlu0 }
 0x1f2   :  { %1350 = vmatprep.mubr.msk.bf16.mxu0 %vm443_vm3, %v435_v29  ;;  %v381_v29 = vrot.slane %v380_v61, 2 }
 0x1f5   :  { %v436_v3 = vpop.trf.xlu0  ;;  %v577_v4 = vpop.trf.xlu1 }
 0x1f6   :  { %1351 = vmatmul.mubr.msk.bf16.vlgmr.msra.gmra.mxu0 %vm443_vm3, %v436_v3  ;;  %1368 = vmatprep.mubr.msk.bf16.mxu1 %vm443_vm3, %v577_v4 }
 0x1f7   :  { %1385 = vmatpush3.bf16.msra.mxu0 %v1645_v14 }
 0x1f8   :  { %1420 = vmatprep.subr.bf16.mxu0 %v1592_v44 }
 0x1f9   :  { %v437_v37 = vpop.trf.xlu0  ;;  %v578_v5 = vpop.trf.xlu1 }
 0x1fa   :  { %1369 = vmatmul.mubr.msk.bf16.vlgmr.msra.gmra.mxu1 %vm443_vm3, %v578_v5  ;;  %1354 = vmatprep.mubr.msk.bf16.mxu0 %vm443_vm3, %v437_v37 }
 0x1fb   :  { %1403 = vmatpush3.bf16.msra.mxu1 %v1654_v24 }
 0x1fc   :  { %1440 = vmatprep.subr.bf16.mxu1 %v1592_v44 }
 0x1fd   :  { %v438_v6 = vpop.trf.xlu0  ;;  %v579_v7 = vpop.trf.xlu1 }
 0x1fe   :  { %1355 = vmatmul.mubr.msk.bf16.gmra.mxu0 %vm443_vm3, %v438_v6  ;;  %1372 = vmatprep.mubr.msk.bf16.mxu1 %vm443_vm3, %v579_v7  ;;  %v382_v6 = vadd.f32 %v381_v29, %v380_v61  ;;  %v387_v7 = vrot.slane %v386_v2, 2 }
 0x201   :  { %v439_v9 = vpop.trf.xlu0  ;;  %v580_v10 = vpop.trf.xlu1 }
 0x202   :  { %1373 = vmatmul.mubr.msk.bf16.gmra.mxu1 %vm443_vm3, %v580_v10  ;;  %1358 = vmatprep.mubr.msk.bf16.mxu0 %vm443_vm3, %v439_v9 }
 0x205   :  { %v440_v14 = vpop.trf.xlu0  ;;  %v581_v11 = vpop.trf.xlu1 }
 0x206   :  { %1359 = vmatmul.mubr.msk.bf16.gmra.mxu0 %vm443_vm3, %v440_v14  ;;  %1376 = vmatprep.mubr.msk.bf16.mxu1 %vm443_vm3, %v581_v11  ;;  %v383_v14 = vrot.slane %v382_v6, 1  ;;  %v388_v11 = vadd.f32 %v387_v7, %v386_v2 }
 0x209   :  { %v441_v12 = vpop.trf.xlu0  ;;  %v582_v24 = vpop.trf.xlu1 }
 0x20a   :  { %1377 = vmatmul.mubr.msk.bf16.gmra.mxu1 %vm443_vm3, %v582_v24  ;;  %1362 = vmatprep.mubr.msk.bf16.mxu0 %vm443_vm3, %v441_v12 }
 0x20d   :  { %v442_v13 = vpop.trf.xlu0  ;;  %v583_v15 = vpop.trf.xlu1 }
 0x20e   :  { %1363 = vmatmul.mubr.msk.bf16.gmra.mxu0 %vm443_vm3, %v442_v13  ;;  %1380 = vmatprep.mubr.msk.bf16.mxu1 %vm443_vm3, %v583_v15  ;;  %v384_v13 = vadd.f32 %v383_v14, %v382_v6  ;;  %v389_v15 = vrot.slane %v388_v11, 1 }
 0x211   :  { %v717_v16 = vpop.trf.xlu0  ;;  %v584_v18 = vpop.trf.xlu1 }
 0x212   :  { %1381 = vmatmul.mubr.msk.bf16.gmra.mxu1 %vm443_vm3, %v584_v18  ;;  %1386 = vmatprep.mubr.msk.bf16.mxu0 %vm443_vm3, %v717_v16 }
 0x215   :  { %v718_v19 = vpop.trf.xlu0  ;;  %v857_v20 = vpop.trf.xlu1 }
 0x216   :  { %1387 = vmatmul.mubr.msk.bf16.vlgmr.msra.gmra.mxu0 %vm443_vm3, %v718_v19  ;;  %1404 = vmatprep.mubr.msk.bf16.mxu1 %vm443_vm3, %v857_v20 }
 0x219   :  { %v719_v21 = vpop.trf.xlu0  ;;  %v858_v22 = vpop.trf.xlu1 }
 0x21a   :  { %1405 = vmatmul.mubr.msk.bf16.vlgmr.msra.gmra.mxu1 %vm443_vm3, %v858_v22  ;;  %1390 = vmatprep.mubr.msk.bf16.mxu0 %vm443_vm3, %v719_v21 }
 0x21d   :  { %v720_v25 = vpop.trf.xlu0  ;;  %v859_v26 = vpop.trf.xlu1 }
 0x21e   :  { %1391 = vmatmul.mubr.msk.bf16.gmra.mxu0 %vm443_vm3, %v720_v25  ;;  %1408 = vmatprep.mubr.msk.bf16.mxu1 %vm443_vm3, %v859_v26  ;;  %v390_v25 = vadd.f32 %v389_v15, %v388_v11 }
 0x221   :  { %v721_v28 = vpop.trf.xlu0  ;;  %v860_v30 = vpop.trf.xlu1 }
 0x222   :  { %1409 = vmatmul.mubr.msk.bf16.gmra.mxu1 %vm443_vm3, %v860_v30  ;;  %1394 = vmatprep.mubr.msk.bf16.mxu0 %vm443_vm3, %v721_v28 }
 0x225   :  { %v722_v31 = vpop.trf.xlu0  ;;  %v861_v33 = vpop.trf.xlu1 }
 0x226   :  { %1395 = vmatmul.mubr.msk.bf16.gmra.mxu0 %vm443_vm3, %v722_v31  ;;  %1412 = vmatprep.mubr.msk.bf16.mxu1 %vm443_vm3, %v861_v33 }
 0x229   :  { %v723_v34 = vpop.trf.xlu0  ;;  %v862_v35 = vpop.trf.xlu1 }
 0x22a   :  { %1413 = vmatmul.mubr.msk.bf16.gmra.mxu1 %vm443_vm3, %v862_v35  ;;  %1398 = vmatprep.mubr.msk.bf16.mxu0 %vm443_vm3, %v723_v34 }
 0x22d   :  { %v724_v39 = vpop.trf.xlu0  ;;  %v863_v41 = vpop.trf.xlu1 }
 0x22e   :  { %1399 = vmatmul.mubr.msk.bf16.gmra.mxu0 %vm443_vm3, %v724_v39  ;;  %1416 = vmatprep.mubr.msk.bf16.mxu1 %vm443_vm3, %v863_v41 }
 0x22f   :  { %1436 = vmatprep.mubr.msk.bf16.mxu0 %vm1593_vm4, %v1592_v44 }
 0x231   :  { %v864_v42 = vpop.trf.xlu1 }
 0x232   :  { %1417 = vmatmul.mubr.msk.bf16.gmra.mxu1 %vm443_vm3, %v864_v42 }
 0x233   :  { %1456 = vmatprep.mubr.msk.bf16.mxu1 %vm1593_vm4, %v1592_v44 }
 0x25e   :  { %v243_v45 = vpop.xlane.xlu0 %242 }
 0x25f   :  { %v250_v47 = vmul.f32 0.125, %v243_v45 }
 0x261   :  { %v323_v48 = vsub.f32 %v1657_v27, %v250_v47 }
 0x262   :  { %v280_v49 = vpop.xlane.xlu0 %279  ;;  %v245_v38 = vpop.xlane.xlu1 %244 }
 0x263   :  { %v327_v43 = vsub.f32 %v323_v48, %v280_v49  ;;  %v251_v51 = vmul.f32 0.125, %v245_v38 }
 0x265   :  { %v331_v53 = vmul.f32 1.442695, %v327_v43  ;;  %v324_v54 = vsub.f32 %v1667_v32, %v251_v51  ;;  %v391_v32 = vrot.slane %v1695_v56, 4 }
 0x266   :  { %v247_v55 = vpop.xlane.xlu0 %246  ;;  %v282_v57 = vpop.xlane.xlu1 %281 }
 0x267   :  { %1528 = vpow2.f32 %v331_v53  ;;  %v252_v58 = vmul.f32 0.125, %v247_v55  ;;  %v328_v60 = vsub.f32 %v324_v54, %v282_v57  ;;  %v392_v5 = vadd.f32 %v391_v32, %v1695_v56 }
 0x269   :  { %v333_v63 = vmul.f32 1.442695, %v328_v60  ;;  %v325_v27 = vsub.f32 %v1671_v36, %v252_v58  ;;  %v397_v36 = vrot.slane %v1701_v59, 4  ;;  %v393_v12 = vrot.slane %v392_v5, 2 }
 0x26a   :  { %v284_v0 = vpop.xlane.xlu0 %283  ;;  %v249_v1 = vpop.xlane.xlu1 %248 }
 0x26b   :  { %1530 = vpow2.f32 %v333_v63  ;;  %v329_v8 = vsub.f32 %v325_v27, %v284_v0  ;;  %v253_v17 = vmul.f32 0.125, %v249_v1  ;;  %v398_v50 = vadd.f32 %v397_v36, %v1701_v59 }
 0x26c   :  { %v394_v16 = vadd.f32 %v393_v12, %v392_v5 }
 0x26d   :  { %v335_v3 = vmul.f32 1.442695, %v329_v8  ;;  %v326_v4 = vsub.f32 %v1677_v40, %v253_v17  ;;  %v399_v18 = vrot.slane %v398_v50, 2 }
 0x26e   :  { %v286_v37 = vpop.xlane.xlu1 %285  ;;  %v395_v26 = vrot.slane %v394_v16, 1 }
 0x26f   :  { %1532 = vpow2.f32 %v335_v3  ;;  %v330_v46 = vsub.f32 %v326_v4, %v286_v37  ;;  %v400_v28 = vadd.f32 %v399_v18, %v398_v50 }
 0x270   :  { %v396_v39 = vadd.f32 %v395_v26, %v394_v16 }
 0x271   :  { %v337_v9 = vmul.f32 1.442695, %v330_v46  ;;  %v401_v41 = vrot.slane %v400_v28, 1 }
 0x273   :  { %1534 = vpow2.f32 %v337_v9  ;;  %v402_v49 = vadd.f32 %v401_v41, %v400_v28 }
 0x274   :  { %v1529_v10 = vpop.eup %1528 }
 0x275   :  { %v339_v40 = vadd.f32 0.0001, %v1529_v10 }
 0x277   :  { %v1777_v56 = vmul.f32 0.15075567, %v339_v40 }
 0x278   :  { %v1531_v24 = vpop.eup %1530 }
 0x279   :  { %v347_v59 = vsel %vm272_vm2, %v1777_v56, 0.0  ;;  %v340_v19 = vadd.f32 0.0001, %v1531_v24 }
 0x27a   :  { %v403_v20 = vmul.f32 %v384_v13, %v347_v59 }
 0x27b   :  { %v1782_v21 = vmul.f32 0.15075567, %v340_v19 }
 0x27c   :  { %v1533_v22 = vpop.eup %1532  ;;  %407 = vadd.xlane.f32.xlu0 %v403_v20 }
 0x27d   :  { %v348_v30 = vsel %vm272_vm2, %v1782_v21, 0.0  ;;  %v341_v31 = vadd.f32 0.0001, %v1533_v22 }
 0x27e   :  { %v404_v33 = vmul.f32 %v390_v25, %v348_v30 }
 0x27f   :  { %v1787_v34 = vmul.f32 0.15075567, %v341_v31 }
 0x280   :  { %v1535_v35 = vpop.eup %1534  ;;  %409 = vadd.xlane.f32.xlu1 %v404_v33 }
 0x281   :  { %v349_v42 = vsel %vm272_vm2, %v1787_v34, 0.0  ;;  %v342_v45 = vadd.f32 0.0001, %v1535_v35 }
 0x282   :  { %v405_v47 = vmul.f32 %v396_v39, %v349_v42 }
 0x283   :  { %v1792_v48 = vmul.f32 0.15075567, %v342_v45 }
 0x284   :  { %411 = vadd.xlane.f32.xlu0 %v405_v47 }
 0x285   :  { %v350_v38 = vsel %vm272_vm2, %v1792_v48, 0.0 }
 0x286   :  { %v406_v43 = vmul.f32 %v402_v49, %v350_v38 }
 0x288   :  { %413 = vadd.xlane.f32.xlu1 %v406_v43 }
 0x2b6   :  { %v1797_v51 = vpop.f32.mrf.mxu0 }
 0x2b8   :  { %v1799_v52 = vpop.f32.mrf.mxu0 }
 0x2ba   :  { %v1801_v53 = vpop.f32.mrf.mxu0  ;;  %v1803_v54 = vpop.f32.mrf.mxu1 }
 0x2bc   :  { %v1805_v55 = vpop.f32.mrf.mxu0  ;;  %v1807_v57 = vpop.f32.mrf.mxu1 }
 0x2be   :  { %v1809_v58 = vpop.f32.mrf.mxu0  ;;  %v1811_v60 = vpop.f32.mrf.mxu1 }
 0x2c0   :  { %v1813_v61 = vpop.f32.mrf.mxu0  ;;  %v1815_v62 = vpop.f32.mrf.mxu1 }
 0x2c2   :  { %v1357_v63 = vpop.f32.mrf.mxu0  ;;  %v1817_v27 = vpop.f32.mrf.mxu1 }
 0x2c3   :  { %v996_v41 = vpack.c.bf16 %v1357_v63, %v1809_v58 }
 0x2c4   :  { %v1819_v0 = vpop.f32.mrf.mxu0  ;;  %v1821_v1 = vpop.f32.mrf.mxu1 }
 0x2c5   :  { %v995_v43 = vpack.c.bf16 %v1819_v0, %v1813_v61 }
 0x2c6   :  { %v1360_v8 = vpop.f32.mrf.mxu0  ;;  %v1823_v17 = vpop.f32.mrf.mxu1 }
 0x2c7   :  { %v1004_v58 = vpack.c.bf16 %v1823_v17, %v1817_v27 }
 0x2c8   :  { %v538_v2 = vpop.f32.mrf.mxu0  ;;  %v1825_v32 = vpop.f32.mrf.mxu1 }
 0x2c9   :  { %v1003_v61 = vpack.c.bf16 %v1825_v32, %v1821_v1  ;;  %v1256_v32 = vpack.c.bf16 %v1777_v56, %v1777_v56  ;;  %v1259_v56 = vpack.c.bf16 %v1782_v21, %v1782_v21 }
 0x2ca   :  { %v1361_v29 = vpop.f32.mrf.mxu0  ;;  %v1378_v3 = vpop.f32.mrf.mxu1 }
 0x2cb   :  { %v998_v59 = vpack.c.bf16 %v1361_v29, %v1360_v8 }
 0x2cc   :  { %v541_v4 = vpop.f32.mrf.mxu0  ;;  %v678_v37 = vpop.f32.mrf.mxu1 }
 0x2cd   :  { %v997_v28 = vpack.c.bf16 %v541_v4, %v538_v2 }
 0x2ce   :  { %v1364_v46 = vpop.f32.mrf.mxu0  ;;  %v1379_v5 = vpop.f32.mrf.mxu1 }
 0x2cf   :  { %v1006_v30 = vpack.c.bf16 %v1379_v5, %v1378_v3  ;;  %v994_v3 = vpack.c.bf16 %v1801_v53, %v1797_v51 }
 0x2d0   :  { %v554_v36 = vpop.f32.mrf.mxu0  ;;  %v681_v6 = vpop.f32.mrf.mxu1 }
 0x2d1   :  { %v1005_v42 = vpack.c.bf16 %v681_v6, %v678_v37  ;;  %v993_v37 = vpack.c.bf16 %v1805_v55, %v1799_v52  ;;  %v1001_v52 = vpack.c.bf16 %v1815_v62, %v1807_v57 }
 0x2d2   :  { %v1365_v7 = vpop.f32.mrf.mxu0  ;;  %v1382_v9 = vpop.f32.mrf.mxu1 }
 0x2d3   :  { %v1000_v10 = vpack.c.bf16 %v1365_v7, %v1364_v46  ;;  %v1002_v46 = vpack.c.bf16 %v1811_v60, %v1803_v54 }
 0x2d4   :  { %v557_v50 = vpop.f32.mrf.mxu0  ;;  %v694_v14 = vpop.f32.mrf.mxu1 }
 0x2d5   :  { %1421 = vmatpush3.bf16.msra.mxu0 %v1000_v10  ;;  %v999_v40 = vpack.c.bf16 %v557_v50, %v554_v36 }
 0x2d6   :  { %v1383_v11 = vpop.f32.mrf.mxu1  ;;  %v1827_v12 = vpop.f32.mrf.mxu0  ;;  %1422 = vmatprep.subr.bf16.mxu0 %v1592_v44 }
 0x2d7   :  { %v1008_v24 = vpack.c.bf16 %v1383_v11, %v1382_v9 }
 0x2d8   :  { %v697_v13 = vpop.f32.mrf.mxu1  ;;  %v1830_v15 = vpop.f32.mrf.mxu0 }
 0x2d9   :  { %1423 = vmatpush3.bf16.msra.mxu0 %v999_v40  ;;  %1441 = vmatpush3.bf16.msra.mxu1 %v1008_v24  ;;  %v1007_v19 = vpack.c.bf16 %v697_v13, %v694_v14 }
 0x2da   :  { %v1832_v16 = vpop.f32.mrf.mxu0  ;;  %v1834_v18 = vpop.f32.mrf.mxu1  ;;  %1424 = vmatprep.subr.bf16.mxu0 %v1592_v44  ;;  %1442 = vmatprep.subr.bf16.mxu1 %v1592_v44 }
 0x2db   :  { %v1010_v24 = vpack.c.bf16 %v1832_v16, %v1827_v12  ;;  %v1262_v12 = vpack.c.bf16 %v1787_v34, %v1787_v34 }
 0x2dc   :  { %v1838_v20 = vpop.f32.mrf.mxu0  ;;  %v1840_v22 = vpop.f32.mrf.mxu1 }
 0x2dd   :  { %1425 = vmatpush3.bf16.msra.mxu0 %v998_v59  ;;  %1443 = vmatpush3.bf16.msra.mxu1 %v1007_v19  ;;  %v1009_v59 = vpack.c.bf16 %v1838_v20, %v1830_v15  ;;  %v1265_v15 = vpack.c.bf16 %v1792_v48, %v1792_v48 }
 0x2de   :  { %v1842_v25 = vpop.f32.mrf.mxu0  ;;  %v1844_v26 = vpop.f32.mrf.mxu1  ;;  %1426 = vmatprep.subr.bf16.mxu0 %v1592_v44  ;;  %1444 = vmatprep.subr.bf16.mxu1 %v1592_v44 }
 0x2df   :  { %v1018_v19 = vpack.c.bf16 %v1844_v26, %v1834_v18 }
 0x2e0   :  { %v1848_v31 = vpop.f32.mrf.mxu0  ;;  %v1850_v33 = vpop.f32.mrf.mxu1 }
 0x2e1   :  { %1427 = vmatpush3.bf16.msra.mxu0 %v997_v28  ;;  %1445 = vmatpush3.bf16.msra.mxu1 %v1006_v30  ;;  %v1017_v16 = vpack.c.bf16 %v1850_v33, %v1840_v22 }
 0x2e2   :  { %v1852_v35 = vpop.f32.mrf.mxu0  ;;  %v1854_v39 = vpop.f32.mrf.mxu1  ;;  %1428 = vmatprep.subr.bf16.mxu0 %v1592_v44  ;;  %1446 = vmatprep.subr.bf16.mxu1 %v1592_v44 }
 0x2e3   :  { %v1012_v50 = vpack.c.bf16 %v1852_v35, %v1842_v25 }
 0x2e4   :  { %v1859_v45 = vpop.f32.mrf.mxu0  ;;  %v1861_v47 = vpop.f32.mrf.mxu1 }
 0x2e5   :  { %1429 = vmatpush3.bf16.msra.mxu0 %v996_v41  ;;  %1447 = vmatpush3.bf16.msra.mxu1 %v1005_v42  ;;  %v1011_v11 = vpack.c.bf16 %v1859_v45, %v1848_v31 }
 0x2e6   :  { %v1396_v49 = vpop.f32.mrf.mxu0  ;;  %v1863_v38 = vpop.f32.mrf.mxu1  ;;  %1430 = vmatprep.subr.bf16.mxu0 %v1592_v44  ;;  %1448 = vmatprep.subr.bf16.mxu1 %v1592_v44 }
 0x2e7   :  { %v1020_v40 = vpack.c.bf16 %v1863_v38, %v1854_v39 }
 0x2e8   :  { %v818_v63 = vpop.f32.mrf.mxu0  ;;  %v1871_v8 = vpop.f32.mrf.mxu1 }
 0x2e9   :  { %1431 = vmatpush3.bf16.msra.mxu0 %v995_v43  ;;  %1449 = vmatpush3.bf16.msra.mxu1 %v1004_v58  ;;  %v1019_v13 = vpack.c.bf16 %v1871_v8, %v1861_v47 }
 0x2ea   :  { %v1397_v2 = vpop.f32.mrf.mxu0  ;;  %v1414_v29 = vpop.f32.mrf.mxu1  ;;  %1432 = vmatprep.subr.bf16.mxu0 %v1592_v44  ;;  %1450 = vmatprep.subr.bf16.mxu1 %v1592_v44 }
 0x2eb   :  { %v1014_v21 = vpack.c.bf16 %v1397_v2, %v1396_v49 }
 0x2ec   :  { %v821_v0 = vpop.f32.mrf.mxu0  ;;  %v958_v4 = vpop.f32.mrf.mxu1 }
 0x2ed   :  { %1433 = vmatpush3.bf16.msra.mxu0 %v994_v3  ;;  %1451 = vmatpush3.bf16.msra.mxu1 %v1003_v61  ;;  %v1013_v9 = vpack.c.bf16 %v821_v0, %v818_v63 }
 0x2ee   :  { %v1400_v27 = vpop.f32.mrf.mxu0  ;;  %v1415_v17 = vpop.f32.mrf.mxu1  ;;  %1434 = vmatprep.subr.bf16.mxu0 %v1592_v44  ;;  %1452 = vmatprep.subr.bf16.mxu1 %v1592_v44 }
 0x2ef   :  { %v1022_v10 = vpack.c.bf16 %v1415_v17, %v1414_v29 }
 0x2f0   :  { %v834_v51 = vpop.f32.mrf.mxu0  ;;  %v961_v53 = vpop.f32.mrf.mxu1 }
 0x2f1   :  { %1435 = vmatpush3.bf16.msra.mxu0 %v993_v37  ;;  %1453 = vmatpush3.bf16.msra.mxu1 %v1002_v46  ;;  %v1021_v14 = vpack.c.bf16 %v961_v53, %v958_v4 }
 0x2f2   :  { %v1401_v5 = vpop.f32.mrf.mxu0  ;;  %v1418_v36 = vpop.f32.mrf.mxu1  ;;  %1454 = vmatprep.subr.bf16.mxu1 %v1592_v44  ;;  %1460 = vmatprep.subr.bf16.mxu0 %v1592_v44 }
 0x2f3   :  { %v1016_v54 = vpack.c.bf16 %v1401_v5, %v1400_v27 }
 0x2f4   :  { %v837_v55 = vpop.f32.mrf.mxu0  ;;  %v974_v23 = vpop.f32.mrf.mxu1  ;;  %1437 = vmatmul.mubr.msk.bf16.vlgmr.msra.gmra.mxu0 %vm1888_vm5, %v1256_v32 }
 0x2f5   :  { %1455 = vmatpush3.bf16.msra.mxu1 %v1001_v52  ;;  %1461 = vmatpush3.bf16.msra.mxu0 %v1016_v54  ;;  %v1015_v6 = vpack.c.bf16 %v837_v55, %v834_v51 }
 0x2f6   :  { %v1419_v60 = vpop.f32.mrf.mxu1  ;;  %1462 = vmatprep.subr.bf16.mxu0 %v1592_v44  ;;  %1480 = vmatprep.subr.bf16.mxu1 %v1592_v44 }
 0x2f7   :  { %v1024_v7 = vpack.c.bf16 %v1419_v60, %v1418_v36  ;;  %1476 = vmatprep.mubr.msk.bf16.mxu0 %vm1593_vm4, %v1592_v44 }
 0x2f8   :  { %v977_v57 = vpop.f32.mrf.mxu1  ;;  %1457 = vmatmul.mubr.msk.bf16.vlgmr.msra.gmra.mxu1 %vm1888_vm5, %v1259_v56 }
 0x2f9   :  { %1463 = vmatpush3.bf16.msra.mxu0 %v1015_v6  ;;  %1481 = vmatpush3.bf16.msra.mxu1 %v1024_v7  ;;  %v1023_v62 = vpack.c.bf16 %v977_v57, %v974_v23 }
 0x2fa   :  { %1464 = vmatprep.subr.bf16.mxu0 %v1592_v44  ;;  %1482 = vmatprep.subr.bf16.mxu1 %v1592_v44 }
 0x2fb   :  { %1496 = vmatprep.mubr.msk.bf16.mxu1 %vm1593_vm4, %v1592_v44 }
 0x2fd   :  { %1465 = vmatpush3.bf16.msra.mxu0 %v1014_v21  ;;  %1483 = vmatpush3.bf16.msra.mxu1 %v1023_v62 }
 0x2fe   :  { %1466 = vmatprep.subr.bf16.mxu0 %v1592_v44  ;;  %1484 = vmatprep.subr.bf16.mxu1 %v1592_v44 }
 0x301   :  { %1467 = vmatpush3.bf16.msra.mxu0 %v1013_v9  ;;  %1485 = vmatpush3.bf16.msra.mxu1 %v1022_v10 }
 0x302   :  { %1468 = vmatprep.subr.bf16.mxu0 %v1592_v44  ;;  %1486 = vmatprep.subr.bf16.mxu1 %v1592_v44 }
 0x305   :  { %1469 = vmatpush3.bf16.msra.mxu0 %v1012_v50  ;;  %1487 = vmatpush3.bf16.msra.mxu1 %v1021_v14  ;;  %v408_v18 = vpop.xlane.xlu0 %407 }
 0x306   :  { %1470 = vmatprep.subr.bf16.mxu0 %v1592_v44  ;;  %1488 = vmatprep.subr.bf16.mxu1 %v1592_v44  ;;  %1536 = vrcp.f32 %v408_v18 }
 0x309   :  { %1471 = vmatpush3.bf16.msra.mxu0 %v1011_v11  ;;  %1489 = vmatpush3.bf16.msra.mxu1 %v1020_v40  ;;  %v410_v20 = vpop.xlane.xlu1 %409 }
 0x30a   :  { %1472 = vmatprep.subr.bf16.mxu0 %v1592_v44  ;;  %1490 = vmatprep.subr.bf16.mxu1 %v1592_v44  ;;  %1538 = vrcp.f32 %v410_v20 }
 0x30d   :  { %1473 = vmatpush3.bf16.msra.mxu0 %v1010_v24  ;;  %1491 = vmatpush3.bf16.msra.mxu1 %v1019_v13  ;;  %v412_v41 = vpop.xlane.xlu0 %411 }
 0x30e   :  { %1474 = vmatprep.subr.bf16.mxu0 %v1592_v44  ;;  %1492 = vmatprep.subr.bf16.mxu1 %v1592_v44  ;;  %1540 = vrcp.f32 %v412_v41 }
 0x311   :  { %1475 = vmatpush3.bf16.msra.mxu0 %v1009_v59  ;;  %1493 = vmatpush3.bf16.msra.mxu1 %v1018_v19  ;;  %v414_v42 = vpop.xlane.xlu1 %413 }
 0x312   :  { %1494 = vmatprep.subr.bf16.mxu1 %v1592_v44  ;;  %1542 = vrcp.f32 %v414_v42 }
 0x313   :  { %v1537_v34 = vpop.eup %1536 }
 0x314   :  { %1477 = vmatmul.mubr.msk.bf16.vlgmr.msra.gmra.mxu0 %vm1888_vm5, %v1262_v12 }
 0x315   :  { %1495 = vmatpush3.bf16.msra.mxu1 %v1017_v16 }
 0x317   :  { %v1539_v22 = vpop.eup %1538 }
 0x318   :  { %1497 = vmatmul.mubr.msk.bf16.vlgmr.msra.gmra.mxu1 %vm1888_vm5, %v1265_v15 }
 0x31b   :  { %v1541_v45 = vpop.eup %1540 }
 0x31f   :  { %v1543_v43 = vpop.eup %1542 }
 0x3b4   :  { %v1059_v25 = vpop.f32.mrf.mxu0 }
 0x3b5   :  { %v1185_v44 = vmul.f32 %v1537_v34, %v1059_v25 }
 0x3b6   :  { %v1438_v26 = vpop.f32.mrf.mxu0 }
 0x3b7   :  { %1189 = vst [vmem:[#allocation5] sm:$0xff] %v1185_v44 }
 0x3b8   :  { %v1062_v28 = vpop.f32.mrf.mxu0  ;;  %v1099_v30 = vpop.f32.mrf.mxu1 }
 0x3b9   :  { %v1186_v31 = vmul.f32 %v1539_v22, %v1099_v30 }
 0x3ba   :  { %v1439_v33 = vpop.f32.mrf.mxu0  ;;  %v1458_v35 = vpop.f32.mrf.mxu1 }
 0x3bb   :  { %1190 = vst [vmem:[#allocation5 + $0x8] sm:$0xff] %v1186_v31 }
 0x3bc   :  { %v1102_v48 = vpop.f32.mrf.mxu1 }
 0x3be   :  { %v1459_v39 = vpop.f32.mrf.mxu1 }
 0x3d4   :  { %v1139_v47 = vpop.f32.mrf.mxu0 }
 0x3d5   :  { %v1187_v49 = vmul.f32 %v1541_v45, %v1139_v47 }
 0x3d6   :  { %v1478_v38 = vpop.f32.mrf.mxu0 }
 0x3d7   :  { %1191 = vst [vmem:[#allocation5 + $0x10] sm:$0xff] %v1187_v49 }
 0x3d8   :  { %v1142_v58 = vpop.f32.mrf.mxu0  ;;  %v1179_v63 = vpop.f32.mrf.mxu1 }
 0x3d9   :  { %v1188_v8 = vmul.f32 %v1543_v43, %v1179_v63 }
 0x3da   :  { %v1479_v2 = vpop.f32.mrf.mxu0  ;;  %v1498_v29 = vpop.f32.mrf.mxu1 }
 0x3db   :  { %1192 = vst [vmem:[#allocation5 + $0x18] sm:$0xff] %v1188_v8 }
 0x3dc   :  { %v1182_v3 = vpop.f32.mrf.mxu1 }
 0x3dd   :  { %1575 = shalt.err (!%p1572_p9)
}
 0x3de   :  { %1204 = dma.vmem_to_hbm [thread:$0]  %s1199_s1, 512, %s1956_s3, [#allocation4], %s1589_s15, %s1589_s15, %s1590_s16   ;;  %v1499_v61 = vpop.f32.mrf.mxu1 }
 0x3df   :  { %1586 = dma.done.wait [#allocation4], 512  }
 0x3e0   :  { %1587 = vsyncadd [#allocation4], 4294966784 }
 0x3e1   :  { %1208 = vsyncpa [#allocation3], 1 }
 0x3e2   :  { %1209 = vsyncpa [#allocation4], 1 }

</bundles_post_ra>
